<compile_context>
chip_gen: v6e
topology: v6e:2x2x1
jax: 0.10.0
libtpu: 0.0.40
codegen_flags: <defaults>
</compile_context>

<pallas_src>
import jax
import jax.numpy as jnp
from jax.experimental import pallas as pl
from jax.experimental.pallas import tpu as pltpu

C_IMG = 256      # encoder channels
C_FEAT = 1000    # feature-extractor channels
C_OUT = 256      # conv output channels (C_IMG + C_FEAT == 1256 == conv in-channels)


def _fusion_kernel(img_ref, w_ref, bias_ref, out_ref):
    # img_ref : (1, C_IMG, TM)   NCHW pixel tile (channels = sublanes, pixels = lanes)
    # w_ref   : (C_OUT, C_IMG)   bf16 weight == conv_w[:, :C_IMG]  (resident, const index)
    # bias_ref: (1, C_OUT, 1)    f32 per-batch hoisted term: W_feat @ feat[n] + b
    # out_ref : (1, C_OUT, TM)
    x = img_ref[0].astype(jnp.bfloat16)                       # (C_IMG, TM) bf16 MXU operand
    acc = jnp.dot(w_ref[...], x,
                  preferred_element_type=jnp.float32)         # (C_OUT, TM), f32 accumulate
    y = acc + bias_ref[0]                                     # (C_OUT, 1) broadcast over lanes
    out_ref[0] = jnp.maximum(y, 0.0).astype(out_ref.dtype)


def fusion_forward(img_nchw, feat_vec, conv_w, conv_b):
    """img_nchw: (N, 256, H, W), feat_vec: (N, 1000),
    conv_w: (256, 1256, 1, 1), conv_b: (256,). Returns (N, 256, H, W)."""
    N, C, H, W = img_nchw.shape
    assert C == C_IMG and feat_vec.shape == (N, C_FEAT)
    HW = H * W

    # NCHW -> (N, C, HW): pure reshape (merge trailing dims), no data movement.
    img_flat = img_nchw.reshape(N, C_IMG, HW)

    w2d = conv_w.reshape(C_OUT, C_IMG + C_FEAT)               # (256, 1256)
    w_img = w2d[:, :C_IMG].astype(jnp.bfloat16)               # (256, 256) MXU operand
    w_feat = w2d[:, C_IMG:]                                   # (256, 1000)

    # Hoisted feature + bias term (pixel independent; degenerate M=1 matmul -> XLA).
    feat_bias = (feat_vec @ w_feat.T + conv_b[None, :]).astype(jnp.float32)
    feat_bias = feat_bias.reshape(N, C_OUT, 1)                # lane-broadcastable in-kernel

    # Pixel (lane) tile: full HW for small maps, else a fixed 1024-pixel tile so the
    # double-buffered img+out blocks stay ~4 MB f32 — well under v7x's 64 MiB VMEM
    # and independent of H*W.  Partial last tiles are masked by the Pallas runtime.
    TM = HW if HW <= 1024 else 1024
    n_tiles = pl.cdiv(HW, TM)

    itemsize = jnp.dtype(img_nchw.dtype).itemsize
    cost = pl.CostEstimate(
        flops=2 * N * HW * C_OUT * C_IMG,
        transcendentals=0,
        bytes_accessed=(N * HW * (C_IMG + C_OUT) * itemsize   # img read + out write
                        + C_OUT * C_IMG * 2                   # bf16 weight
                        + N * C_OUT * 4),                     # per-batch bias
    )

    out_flat = pl.pallas_call(
        _fusion_kernel,
        out_shape=jax.ShapeDtypeStruct((N, C_OUT, HW), img_nchw.dtype),
        grid_spec=pltpu.PrefetchScalarGridSpec(
            num_scalar_prefetch=0,
            grid=(N, n_tiles),
            in_specs=[
                pl.BlockSpec((1, C_IMG, TM), lambda n, t: (n, 0, t)),
                # constant index_map: weight is DMA'd once and stays resident in VMEM
                pl.BlockSpec((C_OUT, C_IMG), lambda n, t: (0, 0)),
                pl.BlockSpec((1, C_OUT, 1), lambda n, t: (n, 0, 0)),
            ],
            out_specs=pl.BlockSpec((1, C_OUT, TM), lambda n, t: (n, 0, t)),
        ),
        compiler_params=pltpu.CompilerParams(
            dimension_semantics=("parallel", "parallel"),
            vmem_limit_bytes=32 * 1024 * 1024),
        cost_estimate=cost,
    )(img_flat, w_img, feat_bias)

    # (N, 256, HW) -> NCHW: pure reshape, no transpose.
    return out_flat.reshape(N, C_OUT, H, W)


def _reference(img_nchw, feat_vec, conv_w, conv_b):
    """Pure-JAX replica of the PyTorch forward (for correctness check)."""
    N, C, H, W = img_nchw.shape
    emb = jnp.broadcast_to(feat_vec[:, :, None, None], (N, C_FEAT, H, W))
    emb = jnp.transpose(emb, (0, 1, 3, 2))          # permute (0,1,3,2) — values unchanged
    fused = jnp.concatenate([img_nchw, emb], axis=1)            # (N, 1256, H, W)
    w2d = conv_w.reshape(C_OUT, C_IMG + C_FEAT)
    y = jnp.einsum("nchw,oc->nohw", fused, w2d) + conv_b[None, :, None, None]
    return jnp.maximum(y, 0.0)


if __name__ == "__main__":
    key = jax.random.PRNGKey(0)
    k_img, k_feat, k_w, k_b = jax.random.split(key, 4)

    N, H, W = 2, 8, 8
    img = jax.random.normal(k_img, (N, C_IMG, H, W), dtype=jnp.float32)
    feat = jax.random.normal(k_feat, (N, C_FEAT), dtype=jnp.float32)

    # Deterministic synthetic parameters (Conv2d(1256, 256, kernel_size=1)).
    fan_in = C_IMG + C_FEAT
    bound = 1.0 / jnp.sqrt(fan_in)
    conv_w = jax.random.uniform(k_w, (C_OUT, fan_in, 1, 1),
                                minval=-bound, maxval=bound, dtype=jnp.float32)
    conv_b = jax.random.uniform(k_b, (C_OUT,),
                                minval=-bound, maxval=bound, dtype=jnp.float32)

    out = fusion_forward(img, feat, conv_w, conv_b)
    jax.block_until_ready(out)

    ref = _reference(img, feat, conv_w, conv_b)
    assert out.shape == (N, C_OUT, H, W)
    # bf16 MXU operands -> loosened tolerance vs the f32 reference.
    assert jnp.allclose(out, ref, atol=2e-2, rtol=2e-2)

    print("KERNEL_OK")
</pallas_src>

<mosaic_0001>
module attributes {stable_mosaic.version = 11 : i64} {
  func.func @_fusion_kernel(%arg0: i32, %arg1: i32, %arg2: memref<1x256x64xf32, #tpu.memory_space<vmem>>, %arg3: memref<256x256xbf16, #tpu.memory_space<vmem>>, %arg4: memref<1x256x1xf32, #tpu.memory_space<vmem>>, %arg5: memref<1x256x64xf32, #tpu.memory_space<vmem>>) attributes {dimension_semantics = [#tpu.dimension_semantics<parallel>, #tpu.dimension_semantics<parallel>], iteration_bounds = array<i64: 2, 1>, scalar_prefetch = 0 : i64, scratch_operands = 0 : i64, tpu.core_type = #tpu.core_type<tc>, window_params = [{transform_indices = @transform_0, window_bounds = array<i64: 1, 256, 64>}, {pipeline_mode = #tpu.pipeline_mode<synchronous>, transform_indices = @transform_1, window_bounds = array<i64: 256, 256>}, {transform_indices = @transform_2, window_bounds = array<i64: 1, 256, 1>}, {transform_indices = @transform_3, window_bounds = array<i64: 1, 256, 64>}]} {
    %c0 = arith.constant 0 : index
    %c0_0 = arith.constant 0 : index
    %c0_1 = arith.constant 0 : index
    %0 = vector.load %arg2[%c0, %c0_0, %c0_1] : memref<1x256x64xf32, #tpu.memory_space<vmem>>, vector<1x256x64xf32>
    %1 = vector.shape_cast %0 : vector<1x256x64xf32> to vector<256x64xf32>
    %2 = arith.truncf %1 : vector<256x64xf32> to vector<256x64xbf16>
    %c0_2 = arith.constant 0 : index
    %c0_3 = arith.constant 0 : index
    %3 = vector.load %arg3[%c0_2, %c0_3] : memref<256x256xbf16, #tpu.memory_space<vmem>>, vector<256x256xbf16>
    %cst = arith.constant dense<0.000000e+00> : vector<256x64xf32>
    %4 = tpu.matmul %3, %2, %cst {dimension_numbers = #tpu.dot_dimension_numbers<[1], [0], [0], [1], [0, 0, 1, 1], [], []>} : vector<256x256xbf16>, vector<256x64xbf16>, vector<256x64xf32> -> vector<256x64xf32>
    %c0_4 = arith.constant 0 : index
    %c0_5 = arith.constant 0 : index
    %c0_6 = arith.constant 0 : index
    %5 = vector.load %arg4[%c0_4, %c0_5, %c0_6] : memref<1x256x1xf32, #tpu.memory_space<vmem>>, vector<1x256x1xf32>
    %6 = vector.shape_cast %5 : vector<1x256x1xf32> to vector<256x1xf32>
    %7 = vector.broadcast %6 : vector<256x1xf32> to vector<256x64xf32>
    %8 = arith.addf %4, %7 : vector<256x64xf32>
    %cst_7 = arith.constant 0.000000e+00 : f32
    %9 = vector.broadcast %cst_7 : f32 to vector<256x64xf32>
    %10 = arith.maximumf %8, %9 : vector<256x64xf32>
    %c0_8 = arith.constant 0 : index
    %c0_9 = arith.constant 0 : index
    %c0_10 = arith.constant 0 : index
    %11 = vector.load %arg5[%c0_8, %c0_9, %c0_10] : memref<1x256x64xf32, #tpu.memory_space<vmem>>, vector<1x256x64xf32>
    %12 = vector.shape_cast %11 : vector<1x256x64xf32> to vector<256x64xf32>
    %13 = vector.shape_cast %10 : vector<256x64xf32> to vector<1x256x64xf32>
    tpu.vector_store %arg5[%c0_8, %c0_9, %c0_10], %13 {strides = array<i32>} : memref<1x256x64xf32, #tpu.memory_space<vmem>>, vector<1x256x64xf32>,
    return
  }
  func.func @transform_0(%arg0: i32, %arg1: i32) -> (i32, i32, i32) {
    %c0_i32 = arith.constant 0 : i32
    %c0_i32_0 = arith.constant 0 : i32
    return %arg0, %c0_i32, %arg1 : i32, i32, i32
  }
  func.func @transform_1(%arg0: i32, %arg1: i32) -> (i32, i32) {
    %c0_i32 = arith.constant 0 : i32
    %c0_i32_0 = arith.constant 0 : i32
    %c0_i32_1 = arith.constant 0 : i32
    return %c0_i32, %c0_i32_0 : i32, i32
  }
  func.func @transform_2(%arg0: i32, %arg1: i32) -> (i32, i32, i32) {
    %c0_i32 = arith.constant 0 : i32
    %c0_i32_0 = arith.constant 0 : i32
    %c0_i32_1 = arith.constant 0 : i32
    return %arg0, %c0_i32, %c0_i32_0 : i32, i32, i32
  }
  func.func @transform_3(%arg0: i32, %arg1: i32) -> (i32, i32, i32) {
    %c0_i32 = arith.constant 0 : i32
    %c0_i32_0 = arith.constant 0 : i32
    return %arg0, %c0_i32, %arg1 : i32, i32, i32
  }
}

</mosaic_0001>

<bundles_post_ra>
// kernel: tpu_custom_call.1
= control target key start
LH: loop header
LB: loop body
LE: loop exit
PB: predicated region body
PF: predicated region fallthrough
CT: control target
= control target key end

     0   :  { %s1272_s12 = smov 0   ;;  %s1274_s13 = smov 0   ;;  %s1582_s0 = inlined_call_operand.vmem [shape: f32[2,256,64], index: 0, kind: input, shape index: {}]   ;;  %s1583_s1 = inlined_call_operand.vmem [shape: bf16[256,256], index: 1, kind: input, shape index: {}]   ;;  %s1584_s2 = inlined_call_operand.vmem [shape: f32[2,256,1], index: 2, kind: input, shape index: {}]   ;;  %s1585_s3 = inlined_call_operand.vmem [shape: f32[2,256,64], index: 3, kind: output, shape index: {}]  }
   0x1   :  { %s1276_s14 = smov 0  }
   0x2 LB: > { %s25_s15 = sadd.s32 1, %s1245_s13  ;;  %p980_p0 = scmp.ge.s32.totalorder %s1249_s14, 1  ;;  %s1249_s14 = sphi %s1276_s14, %s13_s14   ;;  %s1245_s13 = sphi %s1274_s13, %s1587_s13   ;;  %s1241_s12 = sphi %s1272_s12, %s1586_s12  }
   0x3   : > { %p27_p1 = scmp.ge.s32.totalorder %s25_s15, 2  ;;  %p166_p2 = scmp.lt.s32.totalorder %s1249_s14, 3 }
   0x5   : > { %s1589_s15 = smov (%p27_p1, %s25_s15), 0  ;;  %p167_p3 = pnand %p980_p0, %p166_p2 }
   0x6   : > { %p201_p4 = scmp.lt.s32.totalorder (!%p167_p3), %s1241_s12, 1 }
   0x7   : > { %170 = sbr.rel (%p167_p3) target bundleno = 312 (0x138), region = 32 }
   0xc   : > { %v1181_v0 = vld [vmem:[%s1583_s1 + $0x4] ss:$8 sps:$4 sm:$0xff]   ;;  %v1251_v1 = vmov 0   ;;  %s1591_s12 = smov (!%p201_p4, %s1241_s12), 1  ;;  %v1179_v62 = vld [vmem:[%s1583_s1] ss:$8 sps:$4 sm:$0xff]  }
   0xd   : > { %1178 = vset.pattern.permute.xlu1 %v1251_v1  ;;  %1177 = vset.pattern.permute.xlu0 %v1251_v1  ;;  %v1184_v2 = vld [vmem:[%s1583_s1 + $0x84] ss:$8 sps:$4 sm:$0xff]   ;;  %s1296_s20 = sshll.u32 %s1591_s12, 8  ;;  %v1182_v63 = vld [vmem:[%s1583_s1 + $0x80] ss:$8 sps:$4 sm:$0xff]   ;;  %vm848_vm0 = vcmask 523264  }
   0xe   : > { %687 = vmatprep.mubr.bf16.mxu0 %v1181_v0  ;;  %751 = vmatprep.mubr.bf16.mxu1 %v1184_v2  ;;  %s1302_s23 = scalar_lea.vmem %s1582_s0, %s1296_s20  ;;  %s1322_s26 = scalar_lea.vmem %s1584_s2, %s1296_s20  ;;  %v1185_v1 = vld [vmem:[%s1583_s1 + $0x14] ss:$8 sps:$4 sm:$0xff]  }
   0xf   : > { %v253_v3 = vld [vmem:[%s1302_s23 + $0xf0] sm:$0xff]  ;;  %v254_v4 = vld [vmem:[%s1302_s23 + $0xf8] sm:$0xff]  ;;  %v251_v8 = vld [vmem:[%s1302_s23 + $0xe0] sm:$0xff]  ;;  %s1494_s21 = scalar_lea.vmem %s1585_s3, %s1296_s20 }
  0x10   : > { %v237_v5 = vld [vmem:[%s1302_s23 + $0x70] sm:$0xff]  ;;  %v270_v6 = vpack.c.bf16 %v254_v4, %v253_v3  ;;  %v238_v7 = vld [vmem:[%s1302_s23 + $0x78] sm:$0xff]  ;;  %v252_v9 = vld [vmem:[%s1302_s23 + $0xe8] sm:$0xff] }
  0x11   : > { %v262_v10 = vpack.c.bf16 %v238_v7, %v237_v5  ;;  %v269_v11 = vpack.c.bf16 %v252_v9, %v251_v8  ;;  %v235_v12 = vld [vmem:[%s1302_s23 + $0x60] sm:$0xff]  ;;  %v236_v13 = vld [vmem:[%s1302_s23 + $0x68] sm:$0xff]  ;;  %v249_v14 = vld [vmem:[%s1302_s23 + $0xd0] sm:$0xff] }
  0x12   : > { %1024 = vmatprep.subr.bf16.mxu0 %v270_v6  ;;  %1136 = vmatprep.subr.bf16.mxu1 %v270_v6  ;;  %v250_v15 = vld [vmem:[%s1302_s23 + $0xd8] sm:$0xff]  ;;  %v261_v16 = vpack.c.bf16 %v236_v13, %v235_v12  ;;  %v233_v18 = vld [vmem:[%s1302_s23 + $0x50] sm:$0xff]  ;;  %v247_v20 = vld [vmem:[%s1302_s23 + $0xc0] sm:$0xff] }
  0x13   : > { %1025 = vmatpush3.bf16.msra.mxu0 %v262_v10  ;;  %1144 = vmatpush3.bf16.msra.mxu1 %v262_v10  ;;  %v268_v17 = vpack.c.bf16 %v250_v15, %v249_v14  ;;  %v234_v19 = vld [vmem:[%s1302_s23 + $0x58] sm:$0xff]  ;;  %v248_v21 = vld [vmem:[%s1302_s23 + $0xc8] sm:$0xff]  ;;  %v231_v24 = vld [vmem:[%s1302_s23 + $0x40] sm:$0xff] }
  0x14   : > { %1026 = vmatprep.subr.bf16.mxu0 %v269_v11  ;;  %1137 = vmatprep.subr.bf16.mxu1 %v269_v11  ;;  %v260_v22 = vpack.c.bf16 %v234_v19, %v233_v18  ;;  %v267_v23 = vpack.c.bf16 %v248_v21, %v247_v20  ;;  %v232_v25 = vld [vmem:[%s1302_s23 + $0x48] sm:$0xff]  ;;  %v245_v26 = vld [vmem:[%s1302_s23 + $0xb0] sm:$0xff]  ;;  %v246_v27 = vld [vmem:[%s1302_s23 + $0xb8] sm:$0xff] }
  0x15   : > { %v305_v28 = vld [vmem:[%s1322_s26 + $0x10] sm:$0xff]  ;;  %v303_v29 = vld [vmem:[%s1322_s26] sm:$0xff]  ;;  %v259_v30 = vpack.c.bf16 %v232_v25, %v231_v24  ;;  %v266_v31 = vpack.c.bf16 %v246_v27, %v245_v26  ;;  %v230_v33 = vld [vmem:[%s1302_s23 + $0x38] sm:$0xff] }
  0x16   : > { %347 = vperm.xlu1 %1178, %v305_v28   ;;  %v229_v32 = vld [vmem:[%s1302_s23 + $0x30] sm:$0xff]  ;;  %v306_v34 = vld [vmem:[%s1322_s26 + $0x18] sm:$0xff]  ;;  %v243_v35 = vld [vmem:[%s1302_s23 + $0xa0] sm:$0xff]  ;;  %337 = vperm.xlu0 %1177, %v303_v29  }
  0x17   : > { %1027 = vmatpush3.bf16.msra.mxu0 %v261_v16  ;;  %1145 = vmatpush3.bf16.msra.mxu1 %v261_v16  ;;  %v244_v36 = vld [vmem:[%s1302_s23 + $0xa8] sm:$0xff]  ;;  %v258_v38 = vpack.c.bf16 %v230_v33, %v229_v32  ;;  %v227_v41 = vld [vmem:[%s1302_s23 + $0x20] sm:$0xff]  ;;  %v241_v43 = vld [vmem:[%s1302_s23 + $0x90] sm:$0xff] }
  0x18   : > { %1028 = vmatprep.subr.bf16.mxu0 %v268_v17  ;;  %1138 = vmatprep.subr.bf16.mxu1 %v268_v17  ;;  %v304_v37 = vld [vmem:[%s1322_s26 + $0x8] sm:$0xff]  ;;  %v265_v40 = vpack.c.bf16 %v244_v36, %v243_v35  ;;  %v242_v44 = vld [vmem:[%s1302_s23 + $0x98] sm:$0xff]  ;;  %v307_v45 = vld [vmem:[%s1322_s26 + $0x20] sm:$0xff] }
  0x19   : > { %v308_v39 = vld [vmem:[%s1322_s26 + $0x28] sm:$0xff]  ;;  %v310_v47 = vld [vmem:[%s1322_s26 + $0x38] sm:$0xff]  ;;  %v264_v48 = vpack.c.bf16 %v242_v44, %v241_v43  ;;  %v225_v49 = vld [vmem:[%s1302_s23 + $0x10] sm:$0xff] }
  0x1a   : > { %352 = vperm.xlu1 %1178, %v306_v34   ;;  %v228_v42 = vld [vmem:[%s1302_s23 + $0x28] sm:$0xff]  ;;  %342 = vperm.xlu0 %1177, %v304_v37   ;;  %v226_v50 = vld [vmem:[%s1302_s23 + $0x18] sm:$0xff]  ;;  %v239_v51 = vld [vmem:[%s1302_s23 + $0x80] sm:$0xff] }
  0x1b   : > { %1029 = vmatpush3.bf16.msra.mxu0 %v260_v22  ;;  %1146 = vmatpush3.bf16.msra.mxu1 %v260_v22  ;;  %v257_v46 = vpack.c.bf16 %v228_v42, %v227_v41  ;;  %v240_v52 = vld [vmem:[%s1302_s23 + $0x88] sm:$0xff]  ;;  %v309_v53 = vld [vmem:[%s1322_s26 + $0x30] sm:$0xff]  ;;  %v256_v54 = vpack.c.bf16 %v226_v50, %v225_v49  ;;  %v223_v57 = vld [vmem:[%s1302_s23] sm:$0xff] }
  0x1c   : > { %1030 = vmatprep.subr.bf16.mxu0 %v267_v23  ;;  %1139 = vmatprep.subr.bf16.mxu1 %v267_v23  ;;  %v312_v55 = vld [vmem:[%s1322_s26 + $0x48] sm:$0xff]  ;;  %v263_v56 = vpack.c.bf16 %v240_v52, %v239_v51  ;;  %v311_v59 = vld [vmem:[%s1322_s26 + $0x40] sm:$0xff]  ;;  %v314_v61 = vld [vmem:[%s1322_s26 + $0x58] sm:$0xff] }
  0x1d   : > { %v224_v58 = vld [vmem:[%s1302_s23 + $0x8] sm:$0xff]  ;;  %v313_v0 = vld [vmem:[%s1322_s26 + $0x50] sm:$0xff]  ;;  %v315_v4 = vld [vmem:[%s1322_s26 + $0x60] sm:$0xff] }
  0x1e   : > { %362 = vperm.xlu1 %1178, %v308_v39   ;;  %357 = vperm.xlu0 %1177, %v307_v45   ;;  %v255_v60 = vpack.c.bf16 %v224_v58, %v223_v57  ;;  %v1187_v2 = vld [vmem:[%s1583_s1 + $0x94] ss:$8 sps:$4 sm:$0xff]   ;;  %v316_v3 = vld [vmem:[%s1322_s26 + $0x68] sm:$0xff]  ;;  %v1189_v6 = vld [vmem:[%s1583_s1 + $0x10] ss:$8 sps:$4 sm:$0xff]  }
  0x1f   : > { %1031 = vmatpush3.bf16.msra.mxu0 %v259_v30  ;;  %1147 = vmatpush3.bf16.msra.mxu1 %v259_v30  ;;  %v318_v5 = vld [vmem:[%s1322_s26 + $0x78] sm:$0xff]  ;;  %v317_v8 = vld [vmem:[%s1322_s26 + $0x70] sm:$0xff]  ;;  %v1191_v9 = vld [vmem:[%s1583_s1 + $0x24] ss:$8 sps:$4 sm:$0xff]  }
  0x20   : > { %1032 = vmatprep.subr.bf16.mxu0 %v266_v31  ;;  %1140 = vmatprep.subr.bf16.mxu1 %v266_v31  ;;  %v1190_v7 = vld [vmem:[%s1583_s1 + $0x90] ss:$8 sps:$4 sm:$0xff]   ;;  %v1193_v10 = vld [vmem:[%s1583_s1 + $0xa4] ss:$8 sps:$4 sm:$0xff]   ;;  %v1195_v14 = vld [vmem:[%s1583_s1 + $0x20] ss:$8 sps:$4 sm:$0xff]  }
  0x21   : > { %v320_v11 = vld [vmem:[%s1322_s26 + $0x88] sm:$0xff]  ;;  %v319_v12 = vld [vmem:[%s1322_s26 + $0x80] sm:$0xff]  ;;  %v322_v13 = vld [vmem:[%s1322_s26 + $0x98] sm:$0xff] }
  0x22   : > { %372 = vperm.xlu1 %1178, %v310_v47   ;;  %367 = vperm.xlu0 %1177, %v309_v53   ;;  %v1196_v15 = vld [vmem:[%s1583_s1 + $0xa0] ss:$8 sps:$4 sm:$0xff]   ;;  %v321_v16 = vld [vmem:[%s1322_s26 + $0x90] sm:$0xff]  ;;  %v326_v21 = vld [vmem:[%s1322_s26 + $0xb8] sm:$0xff] }
  0x23   : > { %1033 = vmatpush3.bf16.msra.mxu0 %v258_v38  ;;  %1148 = vmatpush3.bf16.msra.mxu1 %v258_v38  ;;  %v1197_v17 = vld [vmem:[%s1583_s1 + $0x34] ss:$8 sps:$4 sm:$0xff]   ;;  %v324_v19 = vld [vmem:[%s1322_s26 + $0xa8] sm:$0xff]  ;;  %v323_v20 = vld [vmem:[%s1322_s26 + $0xa0] sm:$0xff] }
  0x24   : > { %1034 = vmatprep.subr.bf16.mxu0 %v265_v40  ;;  %1141 = vmatprep.subr.bf16.mxu1 %v265_v40  ;;  %v1199_v18 = vld [vmem:[%s1583_s1 + $0xb4] ss:$8 sps:$4 sm:$0xff]   ;;  %v1201_v22 = vld [vmem:[%s1583_s1 + $0x30] ss:$8 sps:$4 sm:$0xff]   ;;  %v1203_v25 = vld [vmem:[%s1583_s1 + $0x44] ss:$8 sps:$4 sm:$0xff]  }
  0x25   : > { %v1202_v23 = vld [vmem:[%s1583_s1 + $0xb0] ss:$8 sps:$4 sm:$0xff]   ;;  %v1205_v26 = vld [vmem:[%s1583_s1 + $0xc4] ss:$8 sps:$4 sm:$0xff]   ;;  %v1207_v30 = vld [vmem:[%s1583_s1 + $0x40] ss:$8 sps:$4 sm:$0xff]  }
  0x26   : > { %382 = vperm.xlu1 %1178, %v312_v55   ;;  %377 = vperm.xlu0 %1177, %v311_v59   ;;  %v325_v24 = vld [vmem:[%s1322_s26 + $0xb0] sm:$0xff]  ;;  %v328_v27 = vld [vmem:[%s1322_s26 + $0xc8] sm:$0xff]  ;;  %v327_v28 = vld [vmem:[%s1322_s26 + $0xc0] sm:$0xff] }
  0x27   : > { %1035 = vmatpush3.bf16.msra.mxu0 %v257_v46  ;;  %1149 = vmatpush3.bf16.msra.mxu1 %v257_v46  ;;  %v330_v29 = vld [vmem:[%s1322_s26 + $0xd8] sm:$0xff]  ;;  %v1208_v31 = vld [vmem:[%s1583_s1 + $0xc0] ss:$8 sps:$4 sm:$0xff]   ;;  %v329_v32 = vld [vmem:[%s1322_s26 + $0xd0] sm:$0xff] }
  0x28   : > { %1036 = vmatprep.subr.bf16.mxu0 %v264_v48  ;;  %1142 = vmatprep.subr.bf16.mxu1 %v264_v48  ;;  %v1209_v33 = vld [vmem:[%s1583_s1 + $0x54] ss:$8 sps:$4 sm:$0xff]   ;;  %v332_v35 = vld [vmem:[%s1322_s26 + $0xe8] sm:$0xff]  ;;  %v331_v36 = vld [vmem:[%s1322_s26 + $0xe0] sm:$0xff] }
  0x29   : > { %v1211_v34 = vld [vmem:[%s1583_s1 + $0xd4] ss:$8 sps:$4 sm:$0xff]   ;;  %v1213_v38 = vld [vmem:[%s1583_s1 + $0x50] ss:$8 sps:$4 sm:$0xff]   ;;  %v1215_v41 = vld [vmem:[%s1583_s1 + $0x64] ss:$8 sps:$4 sm:$0xff]  }
  0x2a   : > { %392 = vperm.xlu1 %1178, %v314_v61   ;;  %387 = vperm.xlu0 %1177, %v313_v0   ;;  %v334_v37 = vld [vmem:[%s1322_s26 + $0xf8] sm:$0xff]  ;;  %v333_v40 = vld [vmem:[%s1322_s26 + $0xf0] sm:$0xff]  ;;  %v1217_v42 = vld [vmem:[%s1583_s1 + $0xe4] ss:$8 sps:$4 sm:$0xff]  }
  0x2b   : > { %1037 = vmatpush3.bf16.msra.mxu0 %v256_v54  ;;  %1150 = vmatpush3.bf16.msra.mxu1 %v256_v54  ;;  %v1214_v39 = vld [vmem:[%s1583_s1 + $0xd0] ss:$8 sps:$4 sm:$0xff]   ;;  %v1219_v43 = vld [vmem:[%s1583_s1 + $0x60] ss:$8 sps:$4 sm:$0xff]   ;;  %v1221_v45 = vld [vmem:[%s1583_s1 + $0x74] ss:$8 sps:$4 sm:$0xff]  }
  0x2c   : > { %1038 = vmatprep.subr.bf16.mxu0 %v263_v56  ;;  %1143 = vmatprep.subr.bf16.mxu1 %v263_v56  ;;  %v1220_v44 = vld [vmem:[%s1583_s1 + $0xe0] ss:$8 sps:$4 sm:$0xff]   ;;  %v1223_v46 = vld [vmem:[%s1583_s1 + $0xf4] ss:$8 sps:$4 sm:$0xff]   ;;  %v1225_v47 = vld [vmem:[%s1583_s1 + $0x70] ss:$8 sps:$4 sm:$0xff]  }
  0x2d   : > { %v1226_v48 = vld [vmem:[%s1583_s1 + $0xf0] ss:$8 sps:$4 sm:$0xff]  }
  0x2e   : > { %402 = vperm.xlu1 %1178, %v316_v3   ;;  %397 = vperm.xlu0 %1177, %v315_v4  }
  0x2f   : > { %1039 = vmatpush3.bf16.msra.mxu0 %v255_v60  ;;  %1151 = vmatpush3.bf16.msra.mxu1 %v255_v60 }
  0x32   : > { %688 = vmatmul.mubr.bf16.vlgmr.msra.gmra.mxu0 %v1179_v62  ;;  %752 = vmatmul.mubr.bf16.vlgmr.msra.gmra.mxu1 %v1182_v63 }
  0x33   : > { %695 = vmatprep.mubr.bf16.mxu0 %v1185_v1  ;;  %759 = vmatprep.mubr.bf16.mxu1 %v1187_v2 }
  0x34   : > { %412 = vperm.xlu1 %1178, %v318_v5   ;;  %407 = vperm.xlu0 %1177, %v317_v8  }
  0x38   : > { %422 = vperm.xlu1 %1178, %v320_v11   ;;  %417 = vperm.xlu0 %1177, %v319_v12  }
  0x3a   : > { %696 = vmatmul.mubr.bf16.gmra.mxu0 %v1189_v6  ;;  %760 = vmatmul.mubr.bf16.gmra.mxu1 %v1190_v7 }
  0x3b   : > { %703 = vmatprep.mubr.bf16.mxu0 %v1191_v9  ;;  %767 = vmatprep.mubr.bf16.mxu1 %v1193_v10 }
  0x3c   : > { %432 = vperm.xlu1 %1178, %v322_v13   ;;  %427 = vperm.xlu0 %1177, %v321_v16  }
  0x40   : > { %442 = vperm.xlu1 %1178, %v324_v19   ;;  %437 = vperm.xlu0 %1177, %v323_v20  }
  0x42   : > { %704 = vmatmul.mubr.bf16.gmra.mxu0 %v1195_v14  ;;  %768 = vmatmul.mubr.bf16.gmra.mxu1 %v1196_v15 }
  0x43   : > { %711 = vmatprep.mubr.bf16.mxu0 %v1197_v17  ;;  %775 = vmatprep.mubr.bf16.mxu1 %v1199_v18 }
  0x44   : > { %452 = vperm.xlu1 %1178, %v326_v21   ;;  %447 = vperm.xlu0 %1177, %v325_v24  }
  0x48   : > { %462 = vperm.xlu1 %1178, %v328_v27   ;;  %457 = vperm.xlu0 %1177, %v327_v28  }
  0x4a   : > { %712 = vmatmul.mubr.bf16.gmra.mxu0 %v1201_v22  ;;  %776 = vmatmul.mubr.bf16.gmra.mxu1 %v1202_v23 }
  0x4b   : > { %719 = vmatprep.mubr.bf16.mxu0 %v1203_v25  ;;  %783 = vmatprep.mubr.bf16.mxu1 %v1205_v26 }
  0x4c   : > { %472 = vperm.xlu1 %1178, %v330_v29   ;;  %467 = vperm.xlu0 %1177, %v329_v32  }
  0x50   : > { %482 = vperm.xlu1 %1178, %v332_v35   ;;  %477 = vperm.xlu0 %1177, %v331_v36  }
  0x52   : > { %720 = vmatmul.mubr.bf16.gmra.mxu0 %v1207_v30  ;;  %784 = vmatmul.mubr.bf16.gmra.mxu1 %v1208_v31 }
  0x53   : > { %727 = vmatprep.mubr.bf16.mxu0 %v1209_v33  ;;  %791 = vmatprep.mubr.bf16.mxu1 %v1211_v34 }
  0x54   : > { %492 = vperm.xlu1 %1178, %v334_v37   ;;  %487 = vperm.xlu0 %1177, %v333_v40  }
  0x5a   : > { %728 = vmatmul.mubr.bf16.gmra.mxu0 %v1213_v38  ;;  %792 = vmatmul.mubr.bf16.gmra.mxu1 %v1214_v39 }
  0x5b   : > { %735 = vmatprep.mubr.bf16.mxu0 %v1215_v41  ;;  %799 = vmatprep.mubr.bf16.mxu1 %v1217_v42 }
  0x62   : > { %736 = vmatmul.mubr.bf16.gmra.mxu0 %v1219_v43  ;;  %800 = vmatmul.mubr.bf16.gmra.mxu1 %v1220_v44 }
  0x63   : > { %743 = vmatprep.mubr.bf16.mxu0 %v1221_v45  ;;  %807 = vmatprep.mubr.bf16.mxu1 %v1223_v46 }
  0x6a   : > { %744 = vmatmul.mubr.bf16.gmra.mxu0 %v1225_v47  ;;  %808 = vmatmul.mubr.bf16.gmra.mxu1 %v1226_v48 }
  0x91   : > { %v338_v49 = vpop.permute.xlu0 %337  ;;  %v348_v50 = vpop.permute.xlu1 %347 }
  0x95   : > { %v343_v51 = vpop.permute.xlu0 %342  ;;  %v1464_v52 = vpop.permute.xlu1 %352 }
  0x99   : > { %v1466_v53 = vpop.permute.xlu0 %357  ;;  %v1468_v54 = vpop.permute.xlu1 %362 }
  0x9d   : > { %v1470_v55 = vpop.permute.xlu0 %367  ;;  %v1472_v56 = vpop.permute.xlu1 %372 }
  0xa1   : > { %v1474_v57 = vpop.permute.xlu0 %377  ;;  %v1476_v58 = vpop.permute.xlu1 %382 }
  0xa5   : > { %v1478_v59 = vpop.permute.xlu0 %387  ;;  %v1480_v60 = vpop.permute.xlu1 %392 }
  0xa9   : > { %v1482_v61 = vpop.permute.xlu0 %397  ;;  %v1484_v62 = vpop.permute.xlu1 %402 }
  0xaf   : > { %v1486_v63 = vpop.permute.xlu0 %407  ;;  %v1488_v2 = vpop.permute.xlu1 %412 }
  0xb3   : > { %v418_v5 = vpop.permute.xlu0 %417  ;;  %v423_v14 = vpop.permute.xlu1 %422 }
  0xb7   : > { %v428_v25 = vpop.permute.xlu0 %427  ;;  %v433_v36 = vpop.permute.xlu1 %432 }
  0xbb   : > { %v438_v47 = vpop.permute.xlu0 %437 }
  0xf2   : > { %v1040_v0 = vpop.f32.mrf.mxu0  ;;  %v1088_v1 = vpop.f32.mrf.mxu1 }
  0xf4   : > { %v1041_v3 = vpop.f32.mrf.mxu0  ;;  %v1089_v4 = vpop.f32.mrf.mxu1 }
  0xf5   : > { %v1042_v6 = vadd.f32 %v1041_v3, %v1040_v0  ;;  %v1090_v7 = vadd.f32 %v1089_v4, %v1088_v1 }
  0xf6   : > { %v1043_v8 = vpop.f32.mrf.mxu0  ;;  %v1091_v9 = vpop.f32.mrf.mxu1 }
  0xf7   : > { %v690_v10 = vadd.f32 %v1042_v6, %v338_v49  ;;  %v754_v11 = vadd.f32 %v1090_v7, %v418_v5  ;;  %v443_v6 = vpop.permute.xlu1 %442 }
  0xf8   : > { %v1044_v12 = vpop.f32.mrf.mxu0  ;;  %v1092_v13 = vpop.f32.mrf.mxu1 }
  0xf9   : > { %v816_v15 = vmax.f32 %v690_v10, 0.0  ;;  %v832_v16 = vmax.f32 %v754_v11, 0.0  ;;  %v1045_v17 = vadd.f32 %v1044_v12, %v1043_v8  ;;  %v1093_v18 = vadd.f32 %v1092_v13, %v1091_v9 }
  0xfa   : > { %v1046_v19 = vpop.f32.mrf.mxu0  ;;  %v1094_v20 = vpop.f32.mrf.mxu1 }
  0xfb   : > { %849 = vst.msk [vmem:[%s1494_s21] sm:$0xff] %vm848_vm0, %v816_v15  ;;  %865 = vst.msk [vmem:[%s1494_s21 + $0x80] sm:$0xff] %vm848_vm0, %v832_v16  ;;  %v693_v21 = vadd.f32 %v1045_v17, %v343_v51  ;;  %v757_v22 = vadd.f32 %v1093_v18, %v423_v14  ;;  %v448_v16 = vpop.permute.xlu0 %447 }
  0xfc   : > { %v1047_v23 = vpop.f32.mrf.mxu0  ;;  %v1095_v24 = vpop.f32.mrf.mxu1 }
  0xfd   : > { %v817_v26 = vmax.f32 %v693_v21, 0.0  ;;  %v833_v27 = vmax.f32 %v757_v22, 0.0  ;;  %v1048_v28 = vadd.f32 %v1047_v23, %v1046_v19  ;;  %v1096_v29 = vadd.f32 %v1095_v24, %v1094_v20 }
  0xfe   : > { %v1049_v30 = vpop.f32.mrf.mxu0  ;;  %v1097_v31 = vpop.f32.mrf.mxu1 }
  0xff   : > { %850 = vst.msk [vmem:[%s1494_s21 + $0x8] sm:$0xff] %vm848_vm0, %v817_v26  ;;  %866 = vst.msk [vmem:[%s1494_s21 + $0x88] sm:$0xff] %vm848_vm0, %v833_v27  ;;  %v698_v32 = vadd.f32 %v1048_v28, %v348_v50  ;;  %v762_v33 = vadd.f32 %v1096_v29, %v428_v25  ;;  %v453_v26 = vpop.permute.xlu1 %452 }
 0x100   : > { %v1050_v34 = vpop.f32.mrf.mxu0  ;;  %v1098_v35 = vpop.f32.mrf.mxu1 }
 0x101   : > { %v818_v37 = vmax.f32 %v698_v32, 0.0  ;;  %v834_v38 = vmax.f32 %v762_v33, 0.0  ;;  %v1051_v39 = vadd.f32 %v1050_v34, %v1049_v30  ;;  %v1099_v40 = vadd.f32 %v1098_v35, %v1097_v31 }
 0x102   : > { %v1052_v41 = vpop.f32.mrf.mxu0  ;;  %v1100_v42 = vpop.f32.mrf.mxu1 }
 0x103   : > { %851 = vst.msk [vmem:[%s1494_s21 + $0x10] sm:$0xff] %vm848_vm0, %v818_v37  ;;  %867 = vst.msk [vmem:[%s1494_s21 + $0x90] sm:$0xff] %vm848_vm0, %v834_v38  ;;  %v701_v43 = vadd.f32 %v1051_v39, %v1464_v52  ;;  %v765_v44 = vadd.f32 %v1099_v40, %v433_v36  ;;  %v458_v36 = vpop.permute.xlu0 %457 }
 0x104   : > { %v1053_v45 = vpop.f32.mrf.mxu0  ;;  %v1101_v46 = vpop.f32.mrf.mxu1 }
 0x105   : > { %v819_v48 = vmax.f32 %v701_v43, 0.0  ;;  %v835_v49 = vmax.f32 %v765_v44, 0.0  ;;  %v1054_v50 = vadd.f32 %v1053_v45, %v1052_v41  ;;  %v1102_v51 = vadd.f32 %v1101_v46, %v1100_v42  ;;  %v463_v46 = vpop.permute.xlu1 %462 }
 0x106   : > { %v1055_v0 = vpop.f32.mrf.mxu0  ;;  %v1103_v1 = vpop.f32.mrf.mxu1 }
 0x107   : > { %852 = vst.msk [vmem:[%s1494_s21 + $0x18] sm:$0xff] %vm848_vm0, %v819_v48  ;;  %868 = vst.msk [vmem:[%s1494_s21 + $0x98] sm:$0xff] %vm848_vm0, %v835_v49  ;;  %v706_v3 = vadd.f32 %v1054_v50, %v1466_v53  ;;  %v770_v4 = vadd.f32 %v1102_v51, %v438_v47 }
 0x108   : > { %v1056_v52 = vpop.f32.mrf.mxu0  ;;  %v1104_v5 = vpop.f32.mrf.mxu1 }
 0x109   : > { %v820_v7 = vmax.f32 %v706_v3, 0.0  ;;  %v836_v8 = vmax.f32 %v770_v4, 0.0  ;;  %v1057_v9 = vadd.f32 %v1056_v52, %v1055_v0  ;;  %v1105_v10 = vadd.f32 %v1104_v5, %v1103_v1  ;;  %v468_v52 = vpop.permute.xlu0 %467 }
 0x10a   : > { %v1058_v11 = vpop.f32.mrf.mxu0  ;;  %v1106_v12 = vpop.f32.mrf.mxu1 }
 0x10b   : > { %853 = vst.msk [vmem:[%s1494_s21 + $0x20] sm:$0xff] %vm848_vm0, %v820_v7  ;;  %869 = vst.msk [vmem:[%s1494_s21 + $0xa0] sm:$0xff] %vm848_vm0, %v836_v8  ;;  %v709_v13 = vadd.f32 %v1057_v9, %v1468_v54  ;;  %v773_v14 = vadd.f32 %v1105_v10, %v443_v6 }
 0x10c   : > { %v1059_v53 = vpop.f32.mrf.mxu0  ;;  %v1107_v15 = vpop.f32.mrf.mxu1 }
 0x10d   : > { %v821_v17 = vmax.f32 %v709_v13, 0.0  ;;  %v837_v18 = vmax.f32 %v773_v14, 0.0  ;;  %v1060_v19 = vadd.f32 %v1059_v53, %v1058_v11  ;;  %v1108_v20 = vadd.f32 %v1107_v15, %v1106_v12  ;;  %v473_v14 = vpop.permute.xlu1 %472 }
 0x10e   : > { %v1061_v21 = vpop.f32.mrf.mxu0  ;;  %v1109_v22 = vpop.f32.mrf.mxu1 }
 0x10f   : > { %854 = vst.msk [vmem:[%s1494_s21 + $0x28] sm:$0xff] %vm848_vm0, %v821_v17  ;;  %870 = vst.msk [vmem:[%s1494_s21 + $0xa8] sm:$0xff] %vm848_vm0, %v837_v18  ;;  %v714_v23 = vadd.f32 %v1060_v19, %v1470_v55  ;;  %v778_v24 = vadd.f32 %v1108_v20, %v448_v16 }
 0x110   : > { %v1062_v54 = vpop.f32.mrf.mxu0  ;;  %v1110_v25 = vpop.f32.mrf.mxu1 }
 0x111   : > { %v822_v27 = vmax.f32 %v714_v23, 0.0  ;;  %v838_v28 = vmax.f32 %v778_v24, 0.0  ;;  %v1063_v29 = vadd.f32 %v1062_v54, %v1061_v21  ;;  %v1111_v30 = vadd.f32 %v1110_v25, %v1109_v22  ;;  %v478_v23 = vpop.permute.xlu0 %477 }
 0x112   : > { %v1064_v31 = vpop.f32.mrf.mxu0  ;;  %v1112_v32 = vpop.f32.mrf.mxu1 }
 0x113   : > { %855 = vst.msk [vmem:[%s1494_s21 + $0x30] sm:$0xff] %vm848_vm0, %v822_v27  ;;  %871 = vst.msk [vmem:[%s1494_s21 + $0xb0] sm:$0xff] %vm848_vm0, %v838_v28  ;;  %v717_v33 = vadd.f32 %v1063_v29, %v1472_v56  ;;  %v781_v34 = vadd.f32 %v1111_v30, %v453_v26 }
 0x114   : > { %v1065_v55 = vpop.f32.mrf.mxu0  ;;  %v1113_v35 = vpop.f32.mrf.mxu1 }
 0x115   : > { %v823_v37 = vmax.f32 %v717_v33, 0.0  ;;  %v839_v38 = vmax.f32 %v781_v34, 0.0  ;;  %v1066_v39 = vadd.f32 %v1065_v55, %v1064_v31  ;;  %v1114_v40 = vadd.f32 %v1113_v35, %v1112_v32  ;;  %v483_v32 = vpop.permute.xlu1 %482 }
 0x116   : > { %v1067_v41 = vpop.f32.mrf.mxu0  ;;  %v1115_v42 = vpop.f32.mrf.mxu1 }
 0x117   : > { %856 = vst.msk [vmem:[%s1494_s21 + $0x38] sm:$0xff] %vm848_vm0, %v823_v37  ;;  %872 = vst.msk [vmem:[%s1494_s21 + $0xb8] sm:$0xff] %vm848_vm0, %v839_v38  ;;  %v722_v43 = vadd.f32 %v1066_v39, %v1474_v57  ;;  %v786_v44 = vadd.f32 %v1114_v40, %v458_v36 }
 0x118   : > { %v1068_v56 = vpop.f32.mrf.mxu0  ;;  %v1116_v45 = vpop.f32.mrf.mxu1 }
 0x119   : > { %v824_v47 = vmax.f32 %v722_v43, 0.0  ;;  %v840_v48 = vmax.f32 %v786_v44, 0.0  ;;  %v1069_v49 = vadd.f32 %v1068_v56, %v1067_v41  ;;  %v1117_v50 = vadd.f32 %v1116_v45, %v1115_v42  ;;  %v488_v41 = vpop.permute.xlu0 %487 }
 0x11a   : > { %v1070_v51 = vpop.f32.mrf.mxu0  ;;  %v1118_v0 = vpop.f32.mrf.mxu1 }
 0x11b   : > { %857 = vst.msk [vmem:[%s1494_s21 + $0x40] sm:$0xff] %vm848_vm0, %v824_v47  ;;  %873 = vst.msk [vmem:[%s1494_s21 + $0xc0] sm:$0xff] %vm848_vm0, %v840_v48  ;;  %v725_v1 = vadd.f32 %v1069_v49, %v1476_v58  ;;  %v789_v3 = vadd.f32 %v1117_v50, %v463_v46 }
 0x11c   : > { %v1071_v57 = vpop.f32.mrf.mxu0  ;;  %v1119_v4 = vpop.f32.mrf.mxu1 }
 0x11d   : > { %v825_v5 = vmax.f32 %v725_v1, 0.0  ;;  %v841_v6 = vmax.f32 %v789_v3, 0.0  ;;  %v1072_v7 = vadd.f32 %v1071_v57, %v1070_v51  ;;  %v1120_v8 = vadd.f32 %v1119_v4, %v1118_v0  ;;  %v493_v3 = vpop.permute.xlu1 %492 }
 0x11e   : > { %v1073_v9 = vpop.f32.mrf.mxu0  ;;  %v1121_v10 = vpop.f32.mrf.mxu1 }
 0x11f   : > { %858 = vst.msk [vmem:[%s1494_s21 + $0x48] sm:$0xff] %vm848_vm0, %v825_v5  ;;  %874 = vst.msk [vmem:[%s1494_s21 + $0xc8] sm:$0xff] %vm848_vm0, %v841_v6  ;;  %v730_v11 = vadd.f32 %v1072_v7, %v1478_v59  ;;  %v794_v12 = vadd.f32 %v1120_v8, %v468_v52 }
 0x120   : > { %v1074_v58 = vpop.f32.mrf.mxu0  ;;  %v1122_v13 = vpop.f32.mrf.mxu1 }
 0x121   : > { %v826_v53 = vmax.f32 %v730_v11, 0.0  ;;  %v842_v15 = vmax.f32 %v794_v12, 0.0  ;;  %v1075_v16 = vadd.f32 %v1074_v58, %v1073_v9  ;;  %v1123_v17 = vadd.f32 %v1122_v13, %v1121_v10 }
 0x122   : > { %v1076_v18 = vpop.f32.mrf.mxu0  ;;  %v1124_v19 = vpop.f32.mrf.mxu1 }
 0x123   : > { %859 = vst.msk [vmem:[%s1494_s21 + $0x50] sm:$0xff] %vm848_vm0, %v826_v53  ;;  %875 = vst.msk [vmem:[%s1494_s21 + $0xd0] sm:$0xff] %vm848_vm0, %v842_v15  ;;  %v733_v20 = vadd.f32 %v1075_v16, %v1480_v60  ;;  %v797_v21 = vadd.f32 %v1123_v17, %v473_v14 }
 0x124   : > { %v1077_v59 = vpop.f32.mrf.mxu0  ;;  %v1125_v22 = vpop.f32.mrf.mxu1 }
 0x125   : > { %v827_v24 = vmax.f32 %v733_v20, 0.0  ;;  %v843_v54 = vmax.f32 %v797_v21, 0.0  ;;  %v1078_v25 = vadd.f32 %v1077_v59, %v1076_v18  ;;  %v1126_v26 = vadd.f32 %v1125_v22, %v1124_v19 }
 0x126   : > { %v1079_v27 = vpop.f32.mrf.mxu0  ;;  %v1127_v28 = vpop.f32.mrf.mxu1 }
 0x127   : > { %860 = vst.msk [vmem:[%s1494_s21 + $0x58] sm:$0xff] %vm848_vm0, %v827_v24  ;;  %876 = vst.msk [vmem:[%s1494_s21 + $0xd8] sm:$0xff] %vm848_vm0, %v843_v54  ;;  %v738_v29 = vadd.f32 %v1078_v25, %v1482_v61  ;;  %v802_v30 = vadd.f32 %v1126_v26, %v478_v23 }
 0x128   : > { %v1080_v60 = vpop.f32.mrf.mxu0  ;;  %v1128_v31 = vpop.f32.mrf.mxu1 }
 0x129   : > { %v828_v33 = vmax.f32 %v738_v29, 0.0  ;;  %v844_v34 = vmax.f32 %v802_v30, 0.0  ;;  %v1081_v55 = vadd.f32 %v1080_v60, %v1079_v27  ;;  %v1129_v35 = vadd.f32 %v1128_v31, %v1127_v28 }
 0x12a   : > { %v1082_v36 = vpop.f32.mrf.mxu0  ;;  %v1130_v37 = vpop.f32.mrf.mxu1 }
 0x12b   : > { %861 = vst.msk [vmem:[%s1494_s21 + $0x60] sm:$0xff] %vm848_vm0, %v828_v33  ;;  %877 = vst.msk [vmem:[%s1494_s21 + $0xe0] sm:$0xff] %vm848_vm0, %v844_v34  ;;  %v741_v38 = vadd.f32 %v1081_v55, %v1484_v62  ;;  %v805_v39 = vadd.f32 %v1129_v35, %v483_v32 }
 0x12c   : > { %v1083_v61 = vpop.f32.mrf.mxu0  ;;  %v1131_v40 = vpop.f32.mrf.mxu1 }
 0x12d   : > { %v829_v42 = vmax.f32 %v741_v38, 0.0  ;;  %v845_v43 = vmax.f32 %v805_v39, 0.0  ;;  %v1084_v44 = vadd.f32 %v1083_v61, %v1082_v36  ;;  %v1132_v56 = vadd.f32 %v1131_v40, %v1130_v37 }
 0x12e   : > { %v1085_v45 = vpop.f32.mrf.mxu0  ;;  %v1133_v46 = vpop.f32.mrf.mxu1 }
 0x12f   : > { %862 = vst.msk [vmem:[%s1494_s21 + $0x68] sm:$0xff] %vm848_vm0, %v829_v42  ;;  %878 = vst.msk [vmem:[%s1494_s21 + $0xe8] sm:$0xff] %vm848_vm0, %v845_v43  ;;  %v746_v47 = vadd.f32 %v1084_v44, %v1486_v63  ;;  %v810_v62 = vadd.f32 %v1132_v56, %v488_v41 }
 0x130   : > { %v1086_v48 = vpop.f32.mrf.mxu0  ;;  %v1134_v49 = vpop.f32.mrf.mxu1 }
 0x131   : > { %v830_v50 = vmax.f32 %v746_v47, 0.0  ;;  %v846_v51 = vmax.f32 %v810_v62, 0.0  ;;  %v1087_v0 = vadd.f32 %v1086_v48, %v1085_v45  ;;  %v1135_v1 = vadd.f32 %v1134_v49, %v1133_v46 }
 0x133   : > { %863 = vst.msk [vmem:[%s1494_s21 + $0x70] sm:$0xff] %vm848_vm0, %v830_v50  ;;  %879 = vst.msk [vmem:[%s1494_s21 + $0xf0] sm:$0xff] %vm848_vm0, %v846_v51  ;;  %v749_v57 = vadd.f32 %v1087_v0, %v1488_v2  ;;  %v813_v4 = vadd.f32 %v1135_v1, %v493_v3 }
 0x135   : > { %v831_v52 = vmax.f32 %v749_v57, 0.0  ;;  %v847_v5 = vmax.f32 %v813_v4, 0.0 }
 0x137   : > { %864 = vst.msk [vmem:[%s1494_s21 + $0x78] sm:$0xff] %vm848_vm0, %v831_v52  ;;  %880 = vst.msk [vmem:[%s1494_s21 + $0xf8] sm:$0xff] %vm848_vm0, %v847_v5 }
 0x138 PF: > { %s13_s14 = sadd.s32 1, %s1249_s14   ;;  %s1586_s12 = smov %s1245_s13 }
 0x139   : > { %p10_p5 = scmp.ge.s32.totalorder %s13_s14, 4   ;;  %s1587_s13 = smov %s1589_s15 }
 0x13b   :  { %12 = sbr.rel (!%p10_p5) target bundleno = 2 (0x2), region = 65 }

</bundles_post_ra>
